<compile_context>
chip_gen: v7x
topology: tpu7x:2x2x1
jax: 0.10.0
libtpu: 0.0.40
codegen_flags: <defaults>
</compile_context>

<pallas_src>
import functools

import jax
import jax.numpy as jnp
from jax import lax
from jax.experimental import pallas as pl
from jax.experimental.pallas import tpu as pltpu

EPS = 1e-5          # torch.nn.LayerNorm default eps
DROPOUT_P = 0.1     # nn.Dropout(dropout) probability


def _fused_body(x_ref, gamma_ref, beta_ref, w_ref, b_ref, o_ref,
                dropout_bits, dropout_thr, dropout_inv_keep):
    x = x_ref[...].astype(jnp.float32)                    # (TM, D)
    inv_d = 1.0 / float(x.shape[-1])

    # ---- LayerNorm over the last dim (torch.nn.LayerNorm(size)) ----
    mean = jnp.sum(x, axis=-1, keepdims=True) * inv_d     # XLU reduce
    xc = x - mean
    var = jnp.sum(xc * xc, axis=-1, keepdims=True) * inv_d
    g = gamma_ref[...]                                     # (1, D)
    bt = beta_ref[...]
    normed = xc * lax.rsqrt(var + EPS) * g + bt

    # ---- sublayer: Linear(D -> D) on the MXU (bf16 inputs if W was cast) ----
    w = w_ref[...]
    y = jnp.dot(normed.astype(w.dtype), w, preferred_element_type=jnp.float32)
    y = y + b_ref[...]

    # ---- dropout (training): integer threshold compare + single select ----
    if dropout_bits is not None:
        keep = dropout_bits < jnp.asarray(dropout_thr, dtype=jnp.uint32)
        y = jnp.where(keep, y * dropout_inv_keep, 0.0)

    # ---- residual add ----
    o_ref[...] = (x + y).astype(o_ref.dtype)


def _kernel_with_dropout(x_ref, gamma_ref, beta_ref, w_ref, b_ref, bits_ref,
                         o_ref, *, thr, inv_keep):
    _fused_body(x_ref, gamma_ref, beta_ref, w_ref, b_ref, o_ref,
                bits_ref[...], thr, inv_keep)


def _kernel_no_dropout(x_ref, gamma_ref, beta_ref, w_ref, b_ref, o_ref):
    _fused_body(x_ref, gamma_ref, beta_ref, w_ref, b_ref, o_ref,
                None, None, None)


def sublayer_connection(x, gamma, beta, w, b, *, dropout_p=DROPOUT_P,
                        training=True, rng_key=None, block_rows=256,
                        use_bf16_matmul=True):
    """x: (B, S, D) float32. Returns x + dropout(Linear(LayerNorm(x)))."""
    B, S, D = x.shape
    rows = B * S

    # Clamp the row tile to the problem size and round to a sublane multiple.
    block_rows = max(8, (min(block_rows, rows) + 7) // 8 * 8)
    padded_rows = pl.cdiv(rows, block_rows) * block_rows

    x2 = x.reshape(rows, D)
    if padded_rows != rows:
        x2 = jnp.pad(x2, ((0, padded_rows - rows), (0, 0)))

    gamma2 = gamma.reshape(1, D).astype(jnp.float32)
    beta2 = beta.reshape(1, D).astype(jnp.float32)
    b2 = b.reshape(1, D).astype(jnp.float32)
    # Cast W once in the wrapper: halves its DMA/VMEM cost and keeps the MXU at
    # full bf16 rate on v6e/v7x (accumulation stays f32 inside the kernel).
    w2 = w.astype(jnp.bfloat16) if use_bf16_matmul else w

    row_spec = pl.BlockSpec((block_rows, D), lambda i: (i, 0))
    vec_spec = pl.BlockSpec((1, D), lambda i: (0, 0))
    w_spec = pl.BlockSpec((D, D), lambda i: (0, 0))

    in_specs = [row_spec, vec_spec, vec_spec, w_spec, vec_spec]
    args = [x2, gamma2, beta2, w2, b2]

    apply_dropout = training and dropout_p > 0.0
    if apply_dropout:
        if rng_key is None:
            rng_key = jax.random.PRNGKey(0)
        bits = jax.random.bits(rng_key, (padded_rows, D), dtype=jnp.uint32)
        thr = min(int((1.0 - dropout_p) * 4294967296.0), 4294967295)
        kernel = functools.partial(_kernel_with_dropout, thr=thr,
                                   inv_keep=1.0 / (1.0 - dropout_p))
        in_specs.append(row_spec)
        args.append(bits)
    else:
        kernel = _kernel_no_dropout

    out2 = pl.pallas_call(
        kernel,
        out_shape=jax.ShapeDtypeStruct((padded_rows, D), x.dtype),
        grid_spec=pltpu.PrefetchScalarGridSpec(
            num_scalar_prefetch=0,
            grid=(padded_rows // block_rows,),
            in_specs=in_specs,
            out_specs=row_spec,
        ),
        compiler_params=pltpu.CompilerParams(
            # No carried state across row tiles -> shard across v7x's 2 TCs.
            dimension_semantics=("parallel",),
        ),
    )(*args)

    if padded_rows != rows:
        out2 = out2[:rows]
    return out2.reshape(B, S, D)


if __name__ == "__main__":
    # Small transformer-ish shapes: batch=2, seq=8, hidden=128 (lane-friendly).
    B, S, D = 2, 8, 128

    key = jax.random.PRNGKey(0)
    kx, kw, kb, kd = jax.random.split(key, 4)

    x = jax.random.normal(kx, (B, S, D), dtype=jnp.float32)

    # LayerNorm params (torch defaults: weight=1, bias=0)
    gamma = jnp.ones((D,), dtype=jnp.float32)
    beta = jnp.zeros((D,), dtype=jnp.float32)

    # Deterministic "sublayer" = Linear(D -> D)
    w = jax.random.normal(kw, (D, D), dtype=jnp.float32) * (1.0 / float(D) ** 0.5)
    b = jax.random.normal(kb, (D,), dtype=jnp.float32) * 0.01

    # ---- eval path (dropout off, f32 matmul): validate against pure JAX ----
    out_eval = sublayer_connection(x, gamma, beta, w, b, dropout_p=DROPOUT_P,
                                   training=False, use_bf16_matmul=False)
    jax.block_until_ready(out_eval)

    def reference(x, gamma, beta, w, b):
        mean = jnp.mean(x, axis=-1, keepdims=True)
        var = jnp.mean((x - mean) ** 2, axis=-1, keepdims=True)
        normed = (x - mean) / jnp.sqrt(var + EPS) * gamma + beta
        return x + normed @ w + b

    ref = reference(x, gamma, beta, w, b)
    assert out_eval.shape == x.shape and out_eval.dtype == x.dtype
    assert jnp.allclose(out_eval, ref, atol=5e-2, rtol=5e-2), \
        float(jnp.max(jnp.abs(out_eval - ref)))

    # ---- training path (dropout on, bf16 matmul inputs, f32 accumulate) ----
    out_train = sublayer_connection(x, gamma, beta, w, b, dropout_p=DROPOUT_P,
                                    training=True, rng_key=kd)
    jax.block_until_ready(out_train)
    assert out_train.shape == x.shape and out_train.dtype == x.dtype
    assert bool(jnp.all(jnp.isfinite(out_train)))

    # TODO(synk): `sublayer` is an arbitrary callable in the PyTorch module; a
    # Linear layer is used here as a concrete, fusable instantiation.
    print("KERNEL_OK")
</pallas_src>

<mosaic_0001>
module attributes {stable_mosaic.version = 11 : i64} {
  func.func @_kernel_no_dropout(%arg0: i32, %arg1: memref<16x128xf32, #tpu.memory_space<vmem>>, %arg2: memref<1x128xf32, #tpu.memory_space<vmem>>, %arg3: memref<1x128xf32, #tpu.memory_space<vmem>>, %arg4: memref<128x128xf32, #tpu.memory_space<vmem>>, %arg5: memref<1x128xf32, #tpu.memory_space<vmem>>, %arg6: memref<16x128xf32, #tpu.memory_space<vmem>>) attributes {dimension_semantics = [#tpu.dimension_semantics<parallel>], iteration_bounds = array<i64: 1>, scalar_prefetch = 0 : i64, scratch_operands = 0 : i64, tpu.core_type = #tpu.core_type<tc>, window_params = [{transform_indices = @transform_0, window_bounds = array<i64: 16, 128>}, {pipeline_mode = #tpu.pipeline_mode<synchronous>, transform_indices = @transform_1, window_bounds = array<i64: 1, 128>}, {pipeline_mode = #tpu.pipeline_mode<synchronous>, transform_indices = @transform_2, window_bounds = array<i64: 1, 128>}, {pipeline_mode = #tpu.pipeline_mode<synchronous>, transform_indices = @transform_3, window_bounds = array<i64: 128, 128>}, {pipeline_mode = #tpu.pipeline_mode<synchronous>, transform_indices = @transform_4, window_bounds = array<i64: 1, 128>}, {transform_indices = @transform_5, window_bounds = array<i64: 16, 128>}]} {
    %c0 = arith.constant 0 : index
    %c0_0 = arith.constant 0 : index
    %0 = vector.load %arg1[%c0, %c0_0] : memref<16x128xf32, #tpu.memory_space<vmem>>, vector<16x128xf32>
    %cst = arith.constant dense<0.000000e+00> : vector<16xf32>
    %1 = vector.multi_reduction <add>, %0, %cst [1] : vector<16x128xf32> to vector<16xf32>
    %2 = vector.shape_cast %1 : vector<16xf32> to vector<16x1xf32>
    %cst_1 = arith.constant 7.812500e-03 : f32
    %3 = vector.broadcast %cst_1 : f32 to vector<16x1xf32>
    %4 = arith.mulf %2, %3 : vector<16x1xf32>
    %5 = vector.broadcast %4 : vector<16x1xf32> to vector<16x128xf32>
    %6 = arith.subf %0, %5 : vector<16x128xf32>
    %7 = arith.mulf %6, %6 : vector<16x128xf32>
    %cst_2 = arith.constant dense<0.000000e+00> : vector<16xf32>
    %8 = vector.multi_reduction <add>, %7, %cst_2 [1] : vector<16x128xf32> to vector<16xf32>
    %9 = vector.shape_cast %8 : vector<16xf32> to vector<16x1xf32>
    %cst_3 = arith.constant 7.812500e-03 : f32
    %10 = vector.broadcast %cst_3 : f32 to vector<16x1xf32>
    %11 = arith.mulf %9, %10 : vector<16x1xf32>
    %c0_4 = arith.constant 0 : index
    %c0_5 = arith.constant 0 : index
    %12 = vector.load %arg2[%c0_4, %c0_5] : memref<1x128xf32, #tpu.memory_space<vmem>>, vector<1x128xf32>
    %c0_6 = arith.constant 0 : index
    %c0_7 = arith.constant 0 : index
    %13 = vector.load %arg3[%c0_6, %c0_7] : memref<1x128xf32, #tpu.memory_space<vmem>>, vector<1x128xf32>
    %cst_8 = arith.constant 9.99999974E-6 : f32
    %14 = vector.broadcast %cst_8 : f32 to vector<16x1xf32>
    %15 = arith.addf %11, %14 : vector<16x1xf32>
    %16 = math.rsqrt %15 : vector<16x1xf32>
    %17 = vector.broadcast %16 : vector<16x1xf32> to vector<16x128xf32>
    %18 = arith.mulf %6, %17 : vector<16x128xf32>
    %19 = vector.broadcast %12 : vector<1x128xf32> to vector<16x128xf32>
    %20 = arith.mulf %18, %19 : vector<16x128xf32>
    %21 = vector.broadcast %13 : vector<1x128xf32> to vector<16x128xf32>
    %22 = arith.addf %20, %21 : vector<16x128xf32>
    %c0_9 = arith.constant 0 : index
    %c0_10 = arith.constant 0 : index
    %23 = vector.load %arg4[%c0_9, %c0_10] : memref<128x128xf32, #tpu.memory_space<vmem>>, vector<128x128xf32>
    %cst_11 = arith.constant dense<0.000000e+00> : vector<16x128xf32>
    %24 = tpu.matmul %22, %23, %cst_11 {dimension_numbers = #tpu.dot_dimension_numbers<[1], [0], [0], [1], [0, 0, 1, 1], [], []>} : vector<16x128xf32>, vector<128x128xf32>, vector<16x128xf32> -> vector<16x128xf32>
    %c0_12 = arith.constant 0 : index
    %c0_13 = arith.constant 0 : index
    %25 = vector.load %arg5[%c0_12, %c0_13] : memref<1x128xf32, #tpu.memory_space<vmem>>, vector<1x128xf32>
    %26 = vector.broadcast %25 : vector<1x128xf32> to vector<16x128xf32>
    %27 = arith.addf %24, %26 : vector<16x128xf32>
    %28 = arith.addf %0, %27 : vector<16x128xf32>
    %c0_14 = arith.constant 0 : index
    %c0_15 = arith.constant 0 : index
    %29 = vector.load %arg6[%c0_14, %c0_15] : memref<16x128xf32, #tpu.memory_space<vmem>>, vector<16x128xf32>
    tpu.vector_store %arg6[%c0_14, %c0_15], %28 {strides = array<i32>} : memref<16x128xf32, #tpu.memory_space<vmem>>, vector<16x128xf32>,
    return
  }
  func.func @transform_0(%arg0: i32) -> (i32, i32) {
    %c0_i32 = arith.constant 0 : i32
    %c0_i32_0 = arith.constant 0 : i32
    return %arg0, %c0_i32 : i32, i32
  }
  func.func @transform_1(%arg0: i32) -> (i32, i32) {
    %c0_i32 = arith.constant 0 : i32
    %c0_i32_0 = arith.constant 0 : i32
    %c0_i32_1 = arith.constant 0 : i32
    return %c0_i32, %c0_i32_0 : i32, i32
  }
  func.func @transform_2(%arg0: i32) -> (i32, i32) {
    %c0_i32 = arith.constant 0 : i32
    %c0_i32_0 = arith.constant 0 : i32
    %c0_i32_1 = arith.constant 0 : i32
    return %c0_i32, %c0_i32_0 : i32, i32
  }
  func.func @transform_3(%arg0: i32) -> (i32, i32) {
    %c0_i32 = arith.constant 0 : i32
    %c0_i32_0 = arith.constant 0 : i32
    %c0_i32_1 = arith.constant 0 : i32
    return %c0_i32, %c0_i32_0 : i32, i32
  }
  func.func @transform_4(%arg0: i32) -> (i32, i32) {
    %c0_i32 = arith.constant 0 : i32
    %c0_i32_0 = arith.constant 0 : i32
    %c0_i32_1 = arith.constant 0 : i32
    return %c0_i32, %c0_i32_0 : i32, i32
  }
  func.func @transform_5(%arg0: i32) -> (i32, i32) {
    %c0_i32 = arith.constant 0 : i32
    %c0_i32_0 = arith.constant 0 : i32
    return %arg0, %c0_i32 : i32, i32
  }
}

</mosaic_0001>

<bundles_post_ra>
// kernel: tpu_custom_call.1
= control target key start
LH: loop header
LB: loop body
LE: loop exit
PB: predicated region body
PF: predicated region fallthrough
CT: control target
= control target key end

     0   :  { %10 = vsyncpa [#allocation3], 0  ;;  %s479_s0 = inlined_call_operand.hbm [shape: f32[16,128], index: 0, kind: input, shape index: {}]   ;;  %s480_s1 = inlined_call_operand.vmem [shape: f32[1,128], index: 1, kind: input, shape index: {}]   ;;  %s481_s2 = inlined_call_operand.vmem [shape: f32[1,128], index: 2, kind: input, shape index: {}]   ;;  %s482_s3 = inlined_call_operand.hbm [shape: f32[128,128], index: 3, kind: input, shape index: {}]   ;;  %s483_s4 = inlined_call_operand.vmem [shape: f32[1,128], index: 4, kind: input, shape index: {}]   ;;  %s484_s5 = inlined_call_operand.hbm [shape: f32[16,128], index: 5, kind: output, shape index: {}]  }
   0x1   :  { %11 = vsyncpa [#allocation6], 0 }
   0x2   :  { %12 = vsyncpa [#allocation4], 0  ;;  %s380_s18 = smov [#allocation2]   ;;  %s308_s22 = scalar_lea.hbm %s479_s0, 256 }
   0x3   :  { %s18_s19 = sshll.u32 %s380_s18, 4  ;;  %p309_p0 = scmp.ne.s32.totalorder %s479_s0, %s308_s22  ;;  %s19_s19 = int_to_ptr.vmem [resolvable:$true] %s18_s19 }
   0x4   :  { %p312_p1 = scmp.lt.u32.totalorder %s308_s22, %s479_s0 }
   0x6   :  { %p314_p2 = pnand %p312_p1, %p309_p0 }
   0x8   :  { %317 = shalt.err (!%p314_p2)
}
   0x9   :  { %s318_s27 = scalar_lea.vmem %s19_s19, 256  ;;  %p323_p4 = scmp.lt.s32.totalorder %s19_s19, %s19_s19 }
   0xa   :  { %p319_p3 = scmp.ne.s32.totalorder %s19_s19, %s318_s27  ;;  %p324_p5 = scmp.lt.s32.totalorder %s318_s27, %s318_s27 }
   0xc   :  { %p325_p6 = por %p324_p5, %p323_p4 }
   0xe   :  { %p326_p7 = pnand %p325_p6, %p319_p3 }
  0x10   :  { %329 = shalt.err (!%p326_p7)
}
  0x11   :  { %s381_s28 = smov 128   ;;  %s382_s29 = smov 8  }
  0x12   :  { %24 = dma.hbm_to_vmem [thread:$0]  %s479_s0, 256, %s19_s19, [#allocation3], %s381_s28, %s381_s28, %s382_s29  }
  0x13   :  { %s383_s7 = smov [#allocation5]   ;;  %s330_s11 = scalar_lea.hbm %s482_s3, 2048 }
  0x14   :  { %s34_s8 = sshll.u32 %s383_s7, 4  ;;  %p331_p8 = scmp.ne.s32.totalorder %s482_s3, %s330_s11  ;;  %s35_s8 = int_to_ptr.vmem [resolvable:$true] %s34_s8 }
  0x15   :  { %p334_p9 = scmp.lt.u32.totalorder %s330_s11, %s482_s3 }
  0x17   :  { %p336_p10 = pnand %p334_p9, %p331_p8 }
  0x19   :  { %339 = shalt.err (!%p336_p10)
}
  0x1a   :  { %s340_s16 = scalar_lea.vmem %s35_s8, 2048  ;;  %p345_p12 = scmp.lt.s32.totalorder %s35_s8, %s35_s8 }
  0x1b   :  { %p341_p11 = scmp.ne.s32.totalorder %s35_s8, %s340_s16  ;;  %p346_p13 = scmp.lt.s32.totalorder %s340_s16, %s340_s16 }
  0x1d   :  { %p347_p0 = por %p346_p13, %p345_p12 }
  0x1f   :  { %p348_p1 = pnand %p347_p0, %p341_p11 }
  0x21   :  { %351 = shalt.err (!%p348_p1)
}
  0x22   :  { %40 = dma.hbm_to_vmem [thread:$0]  %s482_s3, 2048, %s35_s8, [#allocation6], %s381_s28, %s381_s28, %s382_s29  }
  0x23   :  { %374 = dma.done.wait [#allocation3], 256  }
  0x24   :  { %375 = vsyncadd [#allocation3], 4294967040 }
  0x25   :  { %376 = dma.done.wait [#allocation6], 2048  }
  0x26   :  { %377 = vsyncadd [#allocation6], 4294965248  ;;  %v445_v0 = vld [vmem:[#allocation2] sm:$0xff]  ;;  %v448_v1 = vld [vmem:[#allocation2 + $0x8] sm:$0xff] }
  0x27   :  { %51 = vadd.xlane.f32.xlu0 %v445_v0  ;;  %v91_v2 = vld [vmem:[#allocation5] sm:$0xff]  ;;  %v92_v3 = vld [vmem:[#allocation5 + $0x8] sm:$0xff]  ;;  %v93_v4 = vld [vmem:[#allocation5 + $0x10] sm:$0xff] }
  0x28   :  { %v267_v5 = vpack.c.bf16 %v92_v3, %v91_v2  ;;  %v94_v6 = vld [vmem:[#allocation5 + $0x18] sm:$0xff]  ;;  %v95_v16 = vld [vmem:[#allocation5 + $0x20] sm:$0xff]  ;;  %v96_v17 = vld [vmem:[#allocation5 + $0x28] sm:$0xff] }
  0x29   :  { %v271_v7 = vpack.c.bf16 %v94_v6, %v93_v4  ;;  %v275_v18 = vpack.c.bf16 %v96_v17, %v95_v16  ;;  %v97_v19 = vld [vmem:[#allocation5 + $0x30] sm:$0xff]  ;;  %v98_v20 = vld [vmem:[#allocation5 + $0x38] sm:$0xff]  ;;  %v99_v22 = vld [vmem:[#allocation5 + $0x40] sm:$0xff] }
  0x2a   :  { %268 = vmatprep.subr.bf16.mxu0 %v267_v5  ;;  %v279_v21 = vpack.c.bf16 %v98_v20, %v97_v19  ;;  %v100_v23 = vld [vmem:[#allocation5 + $0x48] sm:$0xff]  ;;  %v101_v25 = vld [vmem:[#allocation5 + $0x50] sm:$0xff]  ;;  %v102_v26 = vld [vmem:[#allocation5 + $0x58] sm:$0xff] }
  0x2b   :  { %53 = vadd.xlane.f32.xlu0 %v448_v1  ;;  %270 = vmatpush3.bf16.msra.mxu0 %v267_v5  ;;  %v283_v24 = vpack.c.bf16 %v100_v23, %v99_v22  ;;  %v103_v27 = vld [vmem:[#allocation5 + $0x60] sm:$0xff]  ;;  %v287_v28 = vpack.c.bf16 %v102_v26, %v101_v25  ;;  %v104_v29 = vld [vmem:[#allocation5 + $0x68] sm:$0xff]  ;;  %v105_v31 = vld [vmem:[#allocation5 + $0x70] sm:$0xff] }
  0x2c   :  { %272 = vmatprep.subr.bf16.mxu0 %v271_v7  ;;  %v291_v30 = vpack.c.bf16 %v104_v29, %v103_v27  ;;  %v106_v32 = vld [vmem:[#allocation5 + $0x78] sm:$0xff]  ;;  %v211_v41 = vld [vmem:[%s480_s1] ss:$0 sm:$0xff]  ;;  %s384_s1 = smov [#allocation7]  }
  0x2d   :  { %v295_v33 = vpack.c.bf16 %v106_v32, %v105_v31  ;;  %v212_v43 = vld [vmem:[%s481_s2] ss:$0 sm:$0xff]  ;;  %s198_s23 = sshll.u32 %s384_s1, 4  ;;  %s199_s23 = int_to_ptr.vmem [resolvable:$true] %s198_s23 }
  0x2e   :  { %v213_v50 = vld [vmem:[%s483_s4] ss:$0 sm:$0xff]  ;;  %s352_s2 = scalar_lea.vmem %s199_s23, 256  ;;  %p357_p3 = scmp.lt.s32.totalorder %s199_s23, %s199_s23 }
  0x2f   :  { %274 = vmatpush3.bf16.msra.mxu0 %v271_v7  ;;  %p353_p2 = scmp.ne.s32.totalorder %s199_s23, %s352_s2  ;;  %p358_p4 = scmp.lt.s32.totalorder %s352_s2, %s352_s2 }
  0x30   :  { %276 = vmatprep.subr.bf16.mxu0 %v275_v18 }
  0x31   :  { %p359_p5 = por %p358_p4, %p357_p3 }
  0x33   :  { %278 = vmatpush3.bf16.msra.mxu0 %v275_v18  ;;  %p360_p6 = pnand %p359_p5, %p353_p2 }
  0x34   :  { %280 = vmatprep.subr.bf16.mxu0 %v279_v21 }
  0x37   :  { %282 = vmatpush3.bf16.msra.mxu0 %v279_v21 }
  0x38   :  { %284 = vmatprep.subr.bf16.mxu0 %v283_v24 }
  0x3b   :  { %286 = vmatpush3.bf16.msra.mxu0 %v283_v24 }
  0x3c   :  { %288 = vmatprep.subr.bf16.mxu0 %v287_v28 }
  0x3f   :  { %290 = vmatpush3.bf16.msra.mxu0 %v287_v28 }
  0x40   :  { %292 = vmatprep.subr.bf16.mxu0 %v291_v30 }
  0x43   :  { %294 = vmatpush3.bf16.msra.mxu0 %v291_v30 }
  0x44   :  { %296 = vmatprep.subr.bf16.mxu0 %v295_v33 }
  0x47   :  { %298 = vmatpush3.bf16.msra.mxu0 %v295_v33 }
  0xb4   :  { %v52_v8 = vpop.xlane.xlu0 %51 }
  0xb5   :  { %v55_v9 = vmul.f32 0.0078125, %v52_v8 }
  0xb7   :  { %v57_v10 = vsub.f32 %v445_v0, %v55_v9 }
  0xb8   :  { %v54_v11 = vpop.xlane.xlu0 %53 }
  0xb9   :  { %v56_v12 = vmul.f32 0.0078125, %v54_v11  ;;  %v59_v13 = vmul.f32 %v57_v10, %v57_v10 }
  0xbb   :  { %v58_v14 = vsub.f32 %v448_v1, %v56_v12  ;;  %61 = vadd.xlane.f32.xlu1 %v59_v13 }
  0xbd   :  { %v60_v15 = vmul.f32 %v58_v14, %v58_v14 }
  0xbf   :  { %63 = vadd.xlane.f32.xlu1 %v60_v15 }
 0x148   :  { %v62_v34 = vpop.xlane.xlu1 %61 }
 0x149   :  { %v65_v35 = vmul.f32 0.0078125, %v62_v34 }
 0x14b   :  { %v69_v36 = vadd.f32 1e-05, %v65_v35 }
 0x14c   :  { %v64_v37 = vpop.xlane.xlu1 %63 }
 0x14d   :  { %304 = vrsqrt.f32 %v69_v36  ;;  %v66_v38 = vmul.f32 0.0078125, %v64_v37 }
 0x14f   :  { %v70_v39 = vadd.f32 1e-05, %v66_v38 }
 0x151   :  { %306 = vrsqrt.f32 %v70_v39 }
 0x157   :  { %v305_v40 = vpop.eup %304 }
 0x158   :  { %v73_v42 = vmul.f32 %v305_v40, %v57_v10 }
 0x15a   :  { %v81_v44 = vmul.f32 %v211_v41, %v73_v42 }
 0x15b   :  { %v307_v45 = vpop.eup %306 }
 0x15c   :  { %v74_v46 = vmul.f32 %v307_v45, %v58_v14  ;;  %v89_v47 = vadd.f32 %v212_v43, %v81_v44 }
 0x15e   :  { %v82_v48 = vmul.f32 %v211_v41, %v74_v46  ;;  %264 = vmatprep.mubr.f32.mxu0 %v89_v47 }
 0x160   :  { %v90_v49 = vadd.f32 %v212_v43, %v82_v48 }
 0x162   :  { %265 = vmatmul.mubr.f32.vlgmr.msra.gmra.mrb[0].mxu0 %v90_v49 }
 0x235   :  { %v266_v51 = vpop.f32.mrb[0].mxu0 }
 0x236   :  { %v186_v52 = vadd.f32 %v266_v51, %v213_v50  ;;  %v180_v53 = vpop.f32.mrb[1].mxu0 }
 0x237   :  { %v181_v54 = vadd.f32 %v213_v50, %v180_v53 }
 0x238   :  { %v190_v55 = vadd.f32 %v186_v52, %v448_v1 }
 0x239   :  { %v189_v56 = vadd.f32 %v181_v54, %v445_v0 }
 0x23a   :  { %192 = vst [vmem:[#allocation7 + $0x8] sm:$0xff] %v190_v55 }
 0x23b   :  { %191 = vst [vmem:[#allocation7] sm:$0xff] %v189_v56 }
 0x23c   :  { %363 = shalt.err (!%p360_p6)
}
 0x23d   :  { %s364_s25 = scalar_lea.hbm %s484_s5, 256 }
 0x23e   :  { %p365_p7 = scmp.ne.s32.totalorder %s484_s5, %s364_s25  ;;  %p368_p8 = scmp.lt.u32.totalorder %s364_s25, %s484_s5 }
 0x240   :  { %p370_p9 = pnand %p368_p8, %p365_p7 }
 0x242   :  { %373 = shalt.err (!%p370_p9)
}
 0x243   :  { %204 = dma.vmem_to_hbm [thread:$0]  %s199_s23, 256, %s484_s5, [#allocation4], %s381_s28, %s381_s28, %s382_s29  }
 0x244   :  { %378 = dma.done.wait [#allocation4], 256  }
 0x245   :  { %379 = vsyncadd [#allocation4], 4294967040 }
 0x246   :  { %208 = vsyncpa [#allocation3], 1 }
 0x247   :  { %209 = vsyncpa [#allocation6], 1 }
 0x248   :  { %210 = vsyncpa [#allocation4], 1 }

</bundles_post_ra>
